<compile_context>
chip_gen: v7x
topology: tpu7x:2x2x1
jax: 0.10.0
libtpu: 0.0.40
codegen_flags: <defaults>
</compile_context>

<pallas_src>
import jax
import jax.numpy as jnp
from jax import lax
from jax.experimental import pallas as pl
from jax.experimental.pallas import tpu as pltpu


# ---------------------------------------------------------------------------
# Kernels
# ---------------------------------------------------------------------------

def _gather(idx_col, table_tile, out_dtype):
    """Row-gather from a small in-VMEM table via an exact one-hot matmul.

    idx_col:    (TM, 1) int32 token ids
    table_tile: (V, TO) f32
    returns     (TM, TO) out_dtype
    """
    tm = idx_col.shape[0]
    v = table_tile.shape[0]
    iota = lax.broadcasted_iota(jnp.int32, (tm, v), 1)
    onehot = (iota == idx_col).astype(jnp.float32)          # exact 0/1
    out = jnp.dot(onehot, table_tile, preferred_element_type=jnp.float32)
    return out.astype(out_dtype)


def _embed_kernel(idx_ref, emb_ref, out_ref):
    # prefix_projection=False: plain embedding lookup from the (V, TO) stripe.
    out_ref[...] = _gather(idx_ref[...], emb_ref[...], out_ref.dtype)


def _proj_kernel(idx_ref, emb_ref, w1_ref, b1_ref, w2_ref, b2_ref, out_ref):
    # prefix_projection=True: MLP hoisted to the tiny vocab axis.  The (V, TO)
    # stripe of tanh(E@W1+b1)@W2+b2 is recomputed per step (MXU, DMA-hidden).
    h = jnp.tanh(
        jnp.dot(emb_ref[...], w1_ref[...], preferred_element_type=jnp.float32)
        + b1_ref[...])
    tbl = (jnp.dot(h, w2_ref[...], preferred_element_type=jnp.float32)
           + b2_ref[...])
    out_ref[...] = _gather(idx_ref[...], tbl, out_ref.dtype)


# ---------------------------------------------------------------------------
# Tiling
# ---------------------------------------------------------------------------

def _choose_tiles(n, o, k_rows):
    """Pick (TM, TO).

    TM: token rows per tile -- full N when small, else 512 (mult of 8/16/128).
    TO: output lanes per tile -- full O when it fits, else the largest
        multiple of 128 (<=4096) whose double-buffered working set
        (output tile + K-row table/W2 stripe + bias) fits a 24 MiB budget,
        leaving headroom inside the 32 MiB scoped-VMEM limit used on all
        generations (v7x physical VMEM is only 64 MiB).
    """
    tm = n if n <= 512 else 512
    budget = 24 << 20

    def fits(to):
        ws = (2 * tm * to + 2 * k_rows * to + 2 * to) * 4   # f32, double-buffered
        return ws + (1 << 20) <= budget                     # + small-operand slack

    if o <= 4096 and fits(o):
        return tm, o                                        # full-dim lane block
    for to in (4096, 2048, 1024, 512, 256, 128):
        if to <= o and fits(to):
            return tm, to
    return tm, 128


# ---------------------------------------------------------------------------
# Wrapper
# ---------------------------------------------------------------------------

def prefix_encoder(prefix, params, *, prefix_projection, out_dtype=jnp.float32):
    """prefix: (B, L) int indices. Returns (B, L, 2*layers*hidden)."""
    B, L = prefix.shape
    n = B * L
    idx = prefix.reshape(n, 1).astype(jnp.int32)

    cparams = pltpu.CompilerParams(
        dimension_semantics=("parallel", "parallel"),
        vmem_limit_bytes=32 << 20)

    if prefix_projection:
        emb, w1, b1, w2, b2 = (params["emb"], params["w1"], params["b1"],
                               params["w2"], params["b2"])
        o = w2.shape[1]
        tm, to = _choose_tiles(n, o, max(w2.shape[0], emb.shape[0]))
        grid = (pl.cdiv(o, to), pl.cdiv(n, tm))
        out = pl.pallas_call(
            _proj_kernel,
            out_shape=jax.ShapeDtypeStruct((n, o), out_dtype),
            grid=grid,
            in_specs=[
                pl.BlockSpec((tm, 1), lambda j, i: (i, 0)),            # idx col
                pl.BlockSpec(emb.shape, lambda j, i: (0, 0)),          # (V, H)
                pl.BlockSpec(w1.shape, lambda j, i: (0, 0)),           # (H, P)
                pl.BlockSpec(b1.shape, lambda j, i: (0, 0)),           # (1, P)
                pl.BlockSpec((w2.shape[0], to), lambda j, i: (0, j)),  # (P, TO)
                pl.BlockSpec((1, to), lambda j, i: (0, j)),            # (1, TO)
            ],
            out_specs=pl.BlockSpec((tm, to), lambda j, i: (i, j)),
            compiler_params=cparams,
        )(idx, emb, w1, b1, w2, b2)
    else:
        emb_big = params["emb_big"]
        o = emb_big.shape[1]
        tm, to = _choose_tiles(n, o, emb_big.shape[0])
        grid = (pl.cdiv(o, to), pl.cdiv(n, tm))
        out = pl.pallas_call(
            _embed_kernel,
            out_shape=jax.ShapeDtypeStruct((n, o), out_dtype),
            grid=grid,
            in_specs=[
                pl.BlockSpec((tm, 1), lambda j, i: (i, 0)),            # idx col
                pl.BlockSpec((emb_big.shape[0], to), lambda j, i: (0, j)),
            ],
            out_specs=pl.BlockSpec((tm, to), lambda j, i: (i, j)),
            compiler_params=cparams,
        )(idx, emb_big)

    return out.reshape(B, L, o)


# ---------------------------------------------------------------------------
# Pure-JAX reference (correctness check)
# ---------------------------------------------------------------------------

def prefix_encoder_ref(prefix, params, *, prefix_projection):
    if prefix_projection:
        tok = jnp.take(params["emb"], prefix, axis=0)
        h = jnp.tanh(tok @ params["w1"] + params["b1"][0])
        return h @ params["w2"] + params["b2"][0]
    return jnp.take(params["emb_big"], prefix, axis=0)


# ---------------------------------------------------------------------------
# Main
# ---------------------------------------------------------------------------

if __name__ == "__main__":
    pre_seq_len = 8
    hidden_size = 32
    prefix_hidden_size = 64
    num_hidden_layers = 2
    out_dim = num_hidden_layers * 2 * hidden_size          # 128
    batch = 2

    key = jax.random.PRNGKey(0)
    k_emb, k_embbig, k_w1, k_b1, k_w2, k_b2, k_idx = jax.random.split(key, 7)

    params = {
        # projection-path parameters
        "emb": jax.random.normal(k_emb, (pre_seq_len, hidden_size), jnp.float32) * 0.02,
        "w1": jax.random.normal(k_w1, (hidden_size, prefix_hidden_size), jnp.float32) * 0.02,
        "b1": jax.random.normal(k_b1, (1, prefix_hidden_size), jnp.float32) * 0.02,
        "w2": jax.random.normal(k_w2, (prefix_hidden_size, out_dim), jnp.float32) * 0.02,
        "b2": jax.random.normal(k_b2, (1, out_dim), jnp.float32) * 0.02,
        # non-projection-path parameter
        "emb_big": jax.random.normal(k_embbig, (pre_seq_len, out_dim), jnp.float32) * 0.02,
    }

    # Input: (batch, prefix-length) integer prefix token ids.
    prefix = jax.random.randint(k_idx, (batch, pre_seq_len), 0, pre_seq_len, jnp.int32)

    # --- non-projection path (module default) ---
    out_noproj = prefix_encoder(prefix, params, prefix_projection=False)
    jax.block_until_ready(out_noproj)
    ref_noproj = prefix_encoder_ref(prefix, params, prefix_projection=False)
    assert out_noproj.shape == (batch, pre_seq_len, out_dim)
    assert jnp.allclose(out_noproj, ref_noproj, atol=1e-5, rtol=1e-5)

    # --- projection path ---
    out_proj = prefix_encoder(prefix, params, prefix_projection=True)
    jax.block_until_ready(out_proj)
    ref_proj = prefix_encoder_ref(prefix, params, prefix_projection=True)
    assert out_proj.shape == (batch, pre_seq_len, out_dim)
    assert jnp.allclose(out_proj, ref_proj, atol=1e-5, rtol=1e-5)

    print("KERNEL_OK")
</pallas_src>

<mosaic_0001>
module attributes {stable_mosaic.version = 11 : i64} {
  func.func @_embed_kernel(%arg0: i32, %arg1: i32, %arg2: memref<16x1xi32, #tpu.memory_space<vmem>>, %arg3: memref<8x128xf32, #tpu.memory_space<vmem>>, %arg4: memref<16x128xf32, #tpu.memory_space<vmem>>) attributes {dimension_semantics = [#tpu.dimension_semantics<parallel>, #tpu.dimension_semantics<parallel>], iteration_bounds = array<i64: 1, 1>, scalar_prefetch = 0 : i64, scratch_operands = 0 : i64, tpu.core_type = #tpu.core_type<tc>, window_params = [{transform_indices = @transform_0, window_bounds = array<i64: 16, 1>}, {transform_indices = @transform_1, window_bounds = array<i64: 8, 128>}, {transform_indices = @transform_2, window_bounds = array<i64: 16, 128>}]} {
    %c0 = arith.constant 0 : index
    %c0_0 = arith.constant 0 : index
    %0 = vector.load %arg2[%c0, %c0_0] : memref<16x1xi32, #tpu.memory_space<vmem>>, vector<16x1xi32>
    %c0_1 = arith.constant 0 : index
    %c0_2 = arith.constant 0 : index
    %1 = vector.load %arg3[%c0_1, %c0_2] : memref<8x128xf32, #tpu.memory_space<vmem>>, vector<8x128xf32>
    %2 = tpu.iota {dimensions = array<i32: 1>} : vector<16x8xi32>
    %3 = vector.broadcast %0 : vector<16x1xi32> to vector<16x8xi32>
    %4 = arith.cmpi eq, %2, %3 : vector<16x8xi32>
    %5 = arith.extui %4 : vector<16x8xi1> to vector<16x8xi32>
    %6 = arith.sitofp %5 : vector<16x8xi32> to vector<16x8xf32>
    %cst = arith.constant dense<0.000000e+00> : vector<16x128xf32>
    %7 = tpu.matmul %6, %1, %cst {dimension_numbers = #tpu.dot_dimension_numbers<[1], [0], [0], [1], [0, 0, 1, 1], [], []>} : vector<16x8xf32>, vector<8x128xf32>, vector<16x128xf32> -> vector<16x128xf32>
    %c0_3 = arith.constant 0 : index
    %c0_4 = arith.constant 0 : index
    %8 = vector.load %arg4[%c0_3, %c0_4] : memref<16x128xf32, #tpu.memory_space<vmem>>, vector<16x128xf32>
    tpu.vector_store %arg4[%c0_3, %c0_4], %7 {strides = array<i32>} : memref<16x128xf32, #tpu.memory_space<vmem>>, vector<16x128xf32>,
    return
  }
  func.func @transform_0(%arg0: i32, %arg1: i32) -> (i32, i32) {
    %c0_i32 = arith.constant 0 : i32
    %c0_i32_0 = arith.constant 0 : i32
    return %arg1, %c0_i32 : i32, i32
  }
  func.func @transform_1(%arg0: i32, %arg1: i32) -> (i32, i32) {
    %c0_i32 = arith.constant 0 : i32
    %c0_i32_0 = arith.constant 0 : i32
    return %c0_i32, %arg0 : i32, i32
  }
  func.func @transform_2(%arg0: i32, %arg1: i32) -> (i32, i32) {
    %c0_i32 = arith.constant 0 : i32
    return %arg1, %arg0 : i32, i32
  }
}

</mosaic_0001>

<bundles_post_ra>
// kernel: tpu_custom_call.1
= control target key start
LH: loop header
LB: loop body
LE: loop exit
PB: predicated region body
PF: predicated region fallthrough
CT: control target
= control target key end

     0   :  { %s212_s0 = inlined_call_operand.vmem [shape: s32[16,1], index: 0, kind: input, shape index: {}]   ;;  %s213_s1 = inlined_call_operand.vmem [shape: f32[8,128], index: 1, kind: input, shape index: {}]   ;;  %s214_s2 = inlined_call_operand.hbm [shape: f32[16,128], index: 2, kind: output, shape index: {}]  }
   0x1   :  { %v12_v0 = vld [vmem:[%s212_s0] sm:$0xff] }
   0x2   :  { %7 = vsyncpa [#allocation3], 0  ;;  %v171_v1 = vmov 0   ;;  %v13_v2 = vld [vmem:[%s212_s0 + $0x8] sm:$0xff]  ;;  %v14_v3 = vld [vmem:[%s213_s1] sm:$0xff]  ;;  %v15_v4 = vlaneseq  ;;  %vm29_vm0 = vcmask 64512  }
   0x3   :  { %146 = vset.pattern.permute.xlu0 %v171_v1  ;;  %136 = vmatprep.subr.mxu0 %v14_v3  ;;  %v172_v7 = vmov 0.0   ;;  %s173_s0 = smov [#allocation2]  }
   0x4   :  { %18 = vperm.xlu0 %146, %v12_v0   ;;  %137 = vmatpush3.msra.mxu0 %v14_v3  ;;  %v16_v5 = vand.u32 127, %v15_v4  ;;  %s118_s15 = sshll.u32 %s173_s0, 4  ;;  %s119_s15 = int_to_ptr.vmem [resolvable:$true] %s118_s15 }
   0x5   :  { %s147_s1 = scalar_lea.vmem %s119_s15, 256  ;;  %p152_p1 = scmp.lt.s32.totalorder %s119_s15, %s119_s15 }
   0x6   :  { %p148_p0 = scmp.ne.s32.totalorder %s119_s15, %s147_s1  ;;  %p153_p2 = scmp.lt.s32.totalorder %s147_s1, %s147_s1 }
   0x8   :  { %21 = vperm.xlu0 %146, %v13_v2   ;;  %p154_p3 = por %p153_p2, %p152_p1 }
   0xa   :  { %p155_p4 = pnand %p154_p3, %p148_p0 }
  0x83   :  { %v19_v6 = vpop.permute.xlu0 %18 }
  0x84   :  { %vm23_vm1 = vcmp.eq.s32.totalorder %v16_v5, %v19_v6 }
  0x85   :  { %v129_v8 = vsel %vm23_vm1, 1.0, %v172_v7 }
  0x86   :  { %138 = vmatprep.mubr.msk.f32.mxu0 %vm29_vm0, %v129_v8 }
  0x87   :  { %v22_v9 = vpop.permute.xlu0 %21 }
  0x88   :  { %vm24_vm2 = vcmp.eq.s32.totalorder %v16_v5, %v22_v9 }
  0x89   :  { %v130_v10 = vsel %vm24_vm2, 1.0, %v172_v7 }
  0x8a   :  { %139 = vmatmul.mubr.msk.f32.vlgmr.msra.gmra.mrb[0].mxu0 %vm29_vm0, %v130_v10 }
 0x15d   :  { %v140_v11 = vpop.f32.mrb[0].mxu0 }
 0x15e   :  { %112 = vst [vmem:[#allocation2 + $0x8] sm:$0xff] %v140_v11  ;;  %v102_v12 = vpop.f32.mrb[1].mxu0 }
 0x15f   :  { %111 = vst [vmem:[#allocation2] sm:$0xff] %v102_v12 }
 0x160   :  { %158 = shalt.err (!%p155_p4)
}
 0x161   :  { %s159_s18 = scalar_lea.hbm %s214_s2, 256 }
 0x162   :  { %p160_p5 = scmp.ne.s32.totalorder %s214_s2, %s159_s18  ;;  %p163_p6 = scmp.lt.u32.totalorder %s159_s18, %s214_s2 }
 0x164   :  { %p165_p7 = pnand %p163_p6, %p160_p5 }
 0x166   :  { %168 = shalt.err (!%p165_p7)
}
 0x167   :  { %s174_s23 = smov 128   ;;  %s175_s24 = smov 8  }
 0x168   :  { %124 = dma.vmem_to_hbm [thread:$0]  %s119_s15, 256, %s214_s2, [#allocation3], %s174_s23, %s174_s23, %s175_s24  }
 0x169   :  { %169 = dma.done.wait [#allocation3], 256  }
 0x16a   :  { %170 = vsyncadd [#allocation3], 4294967040 }
 0x16b   :  { %128 = vsyncpa [#allocation3], 1 }

</bundles_post_ra>
